<compile_context>
chip_gen: v7x
topology: tpu7x:2x2x1
jax: 0.10.0
libtpu: 0.0.40
codegen_flags: <defaults>
</compile_context>

<pallas_src>
import functools
import math

import jax
import jax.numpy as jnp
from jax.experimental import pallas as pl
from jax.experimental.pallas import tpu as pltpu

ENERGY_STD = 0.05


def _round_up(x, m):
    return (x + m - 1) // m * m


# --------------------------- in-kernel RNG (TPU only) ------------------------

def _uniform_01(shape):
    """Uniform draws strictly inside (0, 1) from the hardware PRNG."""
    bits = pltpu.prng_random_bits(shape)
    mant = bits & 0x7FFFFF                       # low 23 bits, non-negative
    # (mant + 0.5) / 2^23  ->  u in [2^-24, 1 - 2^-24]; logs never blow up.
    return (mant.astype(jnp.float32) + 0.5) * jnp.float32(1.0 / 8388608.0)


def _erfinv(x):
    """Giles-style single-polynomial f32 erfinv: 1 log, 1 sqrt, no divides."""
    w = -jnp.log(1.0 - x * x)                    # x in (-1, 1) exclusive
    # central branch (w < 5)
    wc = w - 2.5
    p = jnp.float32(2.81022636e-08)
    for c in (3.43273939e-07, -3.5233877e-06, -4.39150654e-06, 2.1858087e-04,
              -1.25372503e-03, -4.17768164e-03, 2.46640727e-01, 1.50140941e+00):
        p = p * wc + jnp.float32(c)
    # tail branch (w >= 5) -- rare, but cheap even evaluated vectorized
    wt = jnp.sqrt(w) - 3.0
    q = jnp.float32(-2.00214257e-04)
    for c in (1.00950558e-04, 1.34934322e-03, -3.67342844e-03, 5.73950773e-03,
              -7.62246130e-03, 9.43887047e-03, 1.00167406e+00, 2.83297682e+00):
        q = q * wt + jnp.float32(c)
    return jnp.where(w < 5.0, p, q) * x


def _std_normal(shape):
    """N(0,1) via sqrt(2) * erfinv(2u - 1)."""
    u = _uniform_01(shape)
    return jnp.float32(math.sqrt(2.0)) * _erfinv(2.0 * u - 1.0)


# ----------------------------------- kernel ----------------------------------

def _eb_selective_kernel(*refs, tau, nscale, use_langevin, inkernel_rng):
    if inkernel_rng:
        (seed_ref, x_ref, w0_ref, w1_ref, b0_ref, b1_ref,
         prob_ref, ref0_ref, ref1_ref) = refs
        # Multi-word seeding mixes the tile coordinates into the PRNG state
        # (avoids consecutive-integer per-tile seeds).
        pltpu.prng_seed(seed_ref[0], pl.program_id(0), pl.program_id(1))
    elif use_langevin:
        (x_ref, w0_ref, w1_ref, b0_ref, b1_ref, gn0_ref, gn1_ref, lg_ref,
         prob_ref, ref0_ref, ref1_ref) = refs
    else:
        (x_ref, w0_ref, w1_ref, b0_ref, b1_ref, lg_ref,
         prob_ref, ref0_ref, ref1_ref) = refs

    # Energy evaluator: two lane-dense bf16 MXU matmuls (slot0 / slot1 planes)
    # with f32 accumulate.  x is cast in-kernel on purpose.
    x = x_ref[...].astype(jnp.bfloat16)
    e0 = jnp.dot(x, w0_ref[...], preferred_element_type=jnp.float32) + b0_ref[...]
    e1 = jnp.dot(x, w1_ref[...], preferred_element_type=jnp.float32) + b1_ref[...]

    # LangevinRefinedEnergyModule (training & num_steps > 0 only):
    # d(energy.sum())/d(energy) == 1 exactly, so the refinement is a constant
    # drift (pre-folded into b0/b1 by the wrapper) plus Gaussian noise; the
    # PyTorch module applies exactly one such update (no loop).
    if use_langevin:
        if inkernel_rng:
            e0 = e0 + jnp.float32(nscale) * _std_normal(e0.shape)
            e1 = e1 + jnp.float32(nscale) * _std_normal(e1.shape)
        else:
            e0 = e0 + gn0_ref[...]
            e1 = e1 + gn1_ref[...]

    # EBSelectiveModule: refined_energy = -langevin(energy).
    r0 = -e0
    r1 = -e1
    ref0_ref[...] = r0.astype(ref0_ref.dtype)
    ref1_ref[...] = r1.astype(ref1_ref.dtype)

    # gumbel_softmax([r0, r1], tau, hard=False, dim=-1)[..., 0]
    #   = sigmoid((r0 - r1 + (g0 - g1)) / tau),  g0 - g1 ~ Logistic(0, 1)
    # -> a single Logistic draw on the gate plane.  Sampled in eval mode too,
    # exactly like F.gumbel_softmax.
    if inkernel_rng:
        u = _uniform_01(r0.shape)
        lg = jnp.log(u) - jnp.log(1.0 - u)
    else:
        lg = lg_ref[...]
    z = (r0 - r1 + lg) * jnp.float32(1.0 / tau)

    # Numerically safe sigmoid: one exp; the divide goes to the EUP on TPU.
    t = jnp.exp(-jnp.abs(z))
    if inkernel_rng:
        inv = pl.reciprocal(1.0 + t, approx=True)
    else:
        inv = 1.0 / (1.0 + t)
    prob_ref[...] = jnp.where(z >= 0.0, inv, t * inv)


# --------------------------------- wrappers -----------------------------------

def pack_energy_evaluator(weight, bias):
    """One-time re-pack of the interleaved nn.Linear(S, 2G) parameters.

    weight: [2G, S] (rows interleave slot0/slot1), bias: [2G].
    Returns ((w0, w1, b0, b1), G, Gp): two lane-dense [S, Gp] bf16 weight
    planes (slot0 / slot1) and two [1, Gp] f32 bias rows, Gp = G rounded up to
    128.  Two planes (instead of one [S, 2Gp] slab) let the gate dimension be
    tiled while keeping each slot0/slot1 pair inside one tile (v7x VMEM fit).
    """
    two_g, s = weight.shape
    assert two_g % 2 == 0
    g = two_g // 2
    gp = _round_up(g, 128)
    w = jnp.asarray(weight, jnp.float32)
    b = jnp.asarray(bias, jnp.float32)
    w0 = jnp.zeros((s, gp), jnp.float32).at[:, :g].set(w[0::2, :].T)
    w1 = jnp.zeros((s, gp), jnp.float32).at[:, :g].set(w[1::2, :].T)
    b0 = jnp.zeros((1, gp), jnp.float32).at[0, :g].set(b[0::2])
    b1 = jnp.zeros((1, gp), jnp.float32).at[0, :g].set(b[1::2])
    return (w0.astype(jnp.bfloat16), w1.astype(jnp.bfloat16), b0, b1), g, gp


def _gate_tile_candidates(gp):
    """Multiples of 128 that divide gp, largest first."""
    c = gp // 128
    return sorted({128 * d for d in range(1, c + 1) if c % d == 0}, reverse=True)


def _choose_tiles(batch, src, gp, ref_bytes, noise_planes, requested_tb, budget):
    """Pick (batch_tile, gate_tile) from an explicit VMEM budget.

    Shrinks the GATE tile first (the weight-plane footprint is independent of
    batch_tile), then the batch tile.  batch_tile is capped at ceil(B/2)
    rounded to 8 so a 2-TensorCore chip (v7x) always gets >= 2 batch steps.
    """
    tb = max(8, min(_round_up(requested_tb, 8),
                    _round_up(max(1, -(-batch // 2)), 8),
                    _round_up(batch, 8)))
    cands = _gate_tile_candidates(gp)

    def est(tb_, tn_):
        return (2 * tb_ * src * 4                 # x, double-buffered f32
                + 2 * 2 * src * tn_ * 2           # w0 + w1 bf16 (2 buffers)
                + 2 * 2 * tn_ * 4                 # biases
                + 2 * tb_ * tn_ * 4               # prob out, double-buffered
                + 2 * 2 * tb_ * tn_ * ref_bytes   # ref0 + ref1 out
                + noise_planes * 2 * tb_ * tn_ * 4)

    target = int(0.8 * budget)
    ti = 0
    tn = cands[ti]
    while est(tb, tn) > target and ti + 1 < len(cands):
        ti += 1
        tn = cands[ti]
    while est(tb, tn) > target and tb > 8:
        tb = max(8, _round_up(tb // 2, 8))
    return tb, tn


def dynamic_eb_selective_forward(
        x, params, gate_number, *, tau=0.1, langevin_step_size=0.05,
        langevin_noise=0.1, langevin_steps=32, training=True, seed=0,
        batch_tile=1024, refined_dtype=jnp.float32,
        vmem_budget_bytes=48 * 1024 * 1024):
    """x: [B, S]; params = (w0, w1, b0, b1) from pack_energy_evaluator.

    Returns (select_prob [B, G], refined_energy [B, G, 2]).
    refined_dtype=jnp.bfloat16 halves the refined-energy writeback (v5e)
    when downstream tolerates it; float32 (default) matches PyTorch.
    """
    w0, w1, b0, b1 = params
    B, S = x.shape
    gp = w0.shape[1]
    g = int(gate_number)
    assert w0.shape[0] == S and g <= gp

    use_langevin = bool(training) and int(langevin_steps) > 0
    # The in-kernel hardware PRNG only lowers on real TPUs; the CPU/interpret
    # fallback streams jax.random noise planes instead.
    on_tpu = jax.default_backend() == "tpu"

    # Fold the constant Langevin drift into the bias rows (gradient of
    # energy.sum() is identically 1): removes one VALU subtract per tile.
    if use_langevin:
        drift = jnp.float32(float(langevin_step_size) * int(langevin_steps))
        b0 = b0 - drift
        b1 = b1 - drift
    nscale = (float(langevin_noise) * math.sqrt(int(langevin_steps))
              if use_langevin else 0.0)

    noise_planes = 0 if on_tpu else (3 if use_langevin else 1)
    ref_bytes = jnp.dtype(refined_dtype).itemsize
    tb, tn = _choose_tiles(B, S, gp, ref_bytes, noise_planes,
                           int(batch_tile), int(vmem_budget_bytes))
    bp = _round_up(B, tb)
    if bp != B:
        x = jnp.pad(x, ((0, bp - B), (0, 0)))
    n_i, n_j = bp // tb, gp // tn

    # Lane-dense tiles everywhere; the x block index is constant in j, so it
    # is not re-DMA'd across gate tiles.  Index maps take *_, which absorbs
    # the scalar-prefetch ref on the TPU path.
    x_spec = pl.BlockSpec((tb, S), lambda i, j, *_: (i, 0))
    w_spec = pl.BlockSpec((S, tn), lambda i, j, *_: (0, j))
    b_spec = pl.BlockSpec((1, tn), lambda i, j, *_: (0, j))
    o_spec = pl.BlockSpec((tb, tn), lambda i, j, *_: (i, j))

    kernel = functools.partial(
        _eb_selective_kernel, tau=float(tau), nscale=nscale,
        use_langevin=use_langevin, inkernel_rng=on_tpu)

    out_shape = (jax.ShapeDtypeStruct((bp, gp), jnp.float32),
                 jax.ShapeDtypeStruct((bp, gp), refined_dtype),
                 jax.ShapeDtypeStruct((bp, gp), refined_dtype))
    out_specs = (o_spec, o_spec, o_spec)

    if on_tpu:
        in_specs = [x_spec, w_spec, w_spec, b_spec, b_spec]
        operands = (jnp.asarray([seed], jnp.int32), x, w0, w1, b0, b1)
        num_prefetch = 1
        cparams = pltpu.CompilerParams(
            dimension_semantics=("parallel", "parallel"),
            vmem_limit_bytes=int(vmem_budget_bytes))
    else:
        key = jax.random.PRNGKey(int(seed))
        kg0, kg1, kl = jax.random.split(key, 3)
        lg = jax.random.logistic(kl, (bp, gp), jnp.float32)
        if use_langevin:
            gn0 = nscale * jax.random.normal(kg0, (bp, gp), jnp.float32)
            gn1 = nscale * jax.random.normal(kg1, (bp, gp), jnp.float32)
            in_specs = [x_spec, w_spec, w_spec, b_spec, b_spec,
                        o_spec, o_spec, o_spec]
            operands = (x, w0, w1, b0, b1, gn0, gn1, lg)
        else:
            in_specs = [x_spec, w_spec, w_spec, b_spec, b_spec, o_spec]
            operands = (x, w0, w1, b0, b1, lg)
        num_prefetch = 0
        cparams = None

    prob_p, ref0_p, ref1_p = pl.pallas_call(
        kernel,
        out_shape=out_shape,
        grid_spec=pltpu.PrefetchScalarGridSpec(
            num_scalar_prefetch=num_prefetch,
            grid=(n_i, n_j),
            in_specs=in_specs,
            out_specs=out_specs),
        compiler_params=cparams,
    )(*operands)

    # Glue: strip padding, restore PyTorch's [B, G, 2] refined-energy view.
    select_prob = prob_p[:B, :g]
    refined_energy = jnp.stack([ref0_p[:B, :g], ref1_p[:B, :g]], axis=-1)
    return select_prob, refined_energy


if __name__ == "__main__":
    # Small shapes: batch=4, source_shape=32, gate_number=16.
    B, S, G = 4, 32, 16

    root = jax.random.PRNGKey(0)
    kx, kw = jax.random.split(root, 2)
    x = jax.random.normal(kx, (B, S), jnp.float32)
    # init_layer_weight(nn.Linear(S, 2*G), ENERGY_STD): N(0, ENERGY_STD)
    # weights, zero bias (deterministic synthetic init).
    weight = ENERGY_STD * jax.random.normal(kw, (2 * G, S), jnp.float32)
    bias = jnp.zeros((2 * G,), jnp.float32)

    # One-time parameter re-pack (hoisted out of the per-call path).
    params, g, gp = pack_energy_evaluator(weight, bias)

    # Training-mode forward (Langevin drift + Gaussian noise + logistic gate noise).
    select_prob, refined_energy = dynamic_eb_selective_forward(
        x, params, gate_number=g, tau=0.1, langevin_step_size=0.05,
        langevin_noise=0.1, langevin_steps=32, training=True, seed=42)
    jax.block_until_ready((select_prob, refined_energy))
    assert select_prob.shape == (B, G)
    assert refined_energy.shape == (B, G, 2)
    assert bool(jnp.all(jnp.isfinite(select_prob)))
    assert bool(jnp.all(jnp.isfinite(refined_energy)))
    assert bool(jnp.all((select_prob >= 0.0) & (select_prob <= 1.0)))

    # Eval-mode forward: refined_energy == -(x @ W.T + b) (up to bf16 matmul
    # rounding); gate noise is still sampled, like F.gumbel_softmax.
    prob_eval, ref_eval = dynamic_eb_selective_forward(
        x, params, gate_number=g, tau=0.1, langevin_step_size=0.05,
        langevin_noise=0.1, langevin_steps=32, training=False, seed=7)
    jax.block_until_ready((prob_eval, ref_eval))
    ref_expected = -(x @ weight.T + bias).reshape(B, G, 2)
    assert bool(jnp.all(jnp.abs(ref_eval - ref_expected) < 5e-2))
    assert bool(jnp.all((prob_eval >= 0.0) & (prob_eval <= 1.0)))

    print("KERNEL_OK")
</pallas_src>

<mosaic_0001>
module attributes {stable_mosaic.version = 11 : i64} {
  func.func @_eb_selective_kernel(%arg0: i32, %arg1: i32, %arg2: memref<8x32xf32, #tpu.memory_space<vmem>>, %arg3: memref<32x128xbf16, #tpu.memory_space<vmem>>, %arg4: memref<32x128xbf16, #tpu.memory_space<vmem>>, %arg5: memref<1x128xf32, #tpu.memory_space<vmem>>, %arg6: memref<1x128xf32, #tpu.memory_space<vmem>>, %arg7: memref<8x128xf32, #tpu.memory_space<vmem>>, %arg8: memref<8x128xf32, #tpu.memory_space<vmem>>, %arg9: memref<8x128xf32, #tpu.memory_space<vmem>>, %arg10: memref<8x128xf32, #tpu.memory_space<vmem>>, %arg11: memref<8x128xf32, #tpu.memory_space<vmem>>, %arg12: memref<8x128xf32, #tpu.memory_space<vmem>>) attributes {dimension_semantics = [#tpu.dimension_semantics<arbitrary>, #tpu.dimension_semantics<arbitrary>], iteration_bounds = array<i64: 1, 1>, scalar_prefetch = 0 : i64, scratch_operands = 0 : i64, tpu.core_type = #tpu.core_type<tc>, window_params = [{transform_indices = @transform_0, window_bounds = array<i64: 8, 32>}, {transform_indices = @transform_1, window_bounds = array<i64: 32, 128>}, {transform_indices = @transform_2, window_bounds = array<i64: 32, 128>}, {transform_indices = @transform_3, window_bounds = array<i64: 1, 128>}, {transform_indices = @transform_4, window_bounds = array<i64: 1, 128>}, {transform_indices = @transform_5, window_bounds = array<i64: 8, 128>}, {transform_indices = @transform_6, window_bounds = array<i64: 8, 128>}, {transform_indices = @transform_7, window_bounds = array<i64: 8, 128>}, {transform_indices = @transform_8, window_bounds = array<i64: 8, 128>}, {transform_indices = @transform_9, window_bounds = array<i64: 8, 128>}, {transform_indices = @transform_10, window_bounds = array<i64: 8, 128>}]} {
    %c0 = arith.constant 0 : index
    %c0_0 = arith.constant 0 : index
    %0 = vector.load %arg2[%c0, %c0_0] : memref<8x32xf32, #tpu.memory_space<vmem>>, vector<8x32xf32>
    %1 = arith.truncf %0 : vector<8x32xf32> to vector<8x32xbf16>
    %c0_1 = arith.constant 0 : index
    %c0_2 = arith.constant 0 : index
    %2 = vector.load %arg3[%c0_1, %c0_2] : memref<32x128xbf16, #tpu.memory_space<vmem>>, vector<32x128xbf16>
    %cst = arith.constant dense<0.000000e+00> : vector<8x128xf32>
    %3 = tpu.matmul %1, %2, %cst {dimension_numbers = #tpu.dot_dimension_numbers<[1], [0], [0], [1], [0, 0, 1, 1], [], []>} : vector<8x32xbf16>, vector<32x128xbf16>, vector<8x128xf32> -> vector<8x128xf32>
    %c0_3 = arith.constant 0 : index
    %c0_4 = arith.constant 0 : index
    %4 = vector.load %arg5[%c0_3, %c0_4] : memref<1x128xf32, #tpu.memory_space<vmem>>, vector<1x128xf32>
    %5 = vector.broadcast %4 : vector<1x128xf32> to vector<8x128xf32>
    %6 = arith.addf %3, %5 : vector<8x128xf32>
    %c0_5 = arith.constant 0 : index
    %c0_6 = arith.constant 0 : index
    %7 = vector.load %arg4[%c0_5, %c0_6] : memref<32x128xbf16, #tpu.memory_space<vmem>>, vector<32x128xbf16>
    %cst_7 = arith.constant dense<0.000000e+00> : vector<8x128xf32>
    %8 = tpu.matmul %1, %7, %cst_7 {dimension_numbers = #tpu.dot_dimension_numbers<[1], [0], [0], [1], [0, 0, 1, 1], [], []>} : vector<8x32xbf16>, vector<32x128xbf16>, vector<8x128xf32> -> vector<8x128xf32>
    %c0_8 = arith.constant 0 : index
    %c0_9 = arith.constant 0 : index
    %9 = vector.load %arg6[%c0_8, %c0_9] : memref<1x128xf32, #tpu.memory_space<vmem>>, vector<1x128xf32>
    %10 = vector.broadcast %9 : vector<1x128xf32> to vector<8x128xf32>
    %11 = arith.addf %8, %10 : vector<8x128xf32>
    %c0_10 = arith.constant 0 : index
    %c0_11 = arith.constant 0 : index
    %12 = vector.load %arg7[%c0_10, %c0_11] : memref<8x128xf32, #tpu.memory_space<vmem>>, vector<8x128xf32>
    %13 = arith.addf %6, %12 : vector<8x128xf32>
    %c0_12 = arith.constant 0 : index
    %c0_13 = arith.constant 0 : index
    %14 = vector.load %arg8[%c0_12, %c0_13] : memref<8x128xf32, #tpu.memory_space<vmem>>, vector<8x128xf32>
    %15 = arith.addf %11, %14 : vector<8x128xf32>
    %cst_14 = arith.constant 0.000000e+00 : f32
    %16 = vector.broadcast %cst_14 : f32 to vector<8x128xf32>
    %17 = arith.subf %16, %13 : vector<8x128xf32>
    %cst_15 = arith.constant 0.000000e+00 : f32
    %18 = vector.broadcast %cst_15 : f32 to vector<8x128xf32>
    %19 = arith.subf %18, %15 : vector<8x128xf32>
    %c0_16 = arith.constant 0 : index
    %c0_17 = arith.constant 0 : index
    %20 = vector.load %arg11[%c0_16, %c0_17] : memref<8x128xf32, #tpu.memory_space<vmem>>, vector<8x128xf32>
    tpu.vector_store %arg11[%c0_16, %c0_17], %17 {strides = array<i32>} : memref<8x128xf32, #tpu.memory_space<vmem>>, vector<8x128xf32>,
    %c0_18 = arith.constant 0 : index
    %c0_19 = arith.constant 0 : index
    %21 = vector.load %arg12[%c0_18, %c0_19] : memref<8x128xf32, #tpu.memory_space<vmem>>, vector<8x128xf32>
    tpu.vector_store %arg12[%c0_18, %c0_19], %19 {strides = array<i32>} : memref<8x128xf32, #tpu.memory_space<vmem>>, vector<8x128xf32>,
    %c0_20 = arith.constant 0 : index
    %c0_21 = arith.constant 0 : index
    %22 = vector.load %arg9[%c0_20, %c0_21] : memref<8x128xf32, #tpu.memory_space<vmem>>, vector<8x128xf32>
    %23 = arith.subf %17, %19 : vector<8x128xf32>
    %24 = arith.addf %23, %22 : vector<8x128xf32>
    %cst_22 = arith.constant 1.000000e+01 : f32
    %25 = vector.broadcast %cst_22 : f32 to vector<8x128xf32>
    %26 = arith.mulf %24, %25 : vector<8x128xf32>
    %27 = math.absf %26 : vector<8x128xf32>
    %cst_23 = arith.constant 0.000000e+00 : f32
    %28 = vector.broadcast %cst_23 : f32 to vector<8x128xf32>
    %29 = arith.subf %28, %27 : vector<8x128xf32>
    %30 = math.exp %29 : vector<8x128xf32>
    %cst_24 = arith.constant 1.000000e+00 : f32
    %31 = vector.broadcast %cst_24 : f32 to vector<8x128xf32>
    %32 = arith.addf %31, %30 : vector<8x128xf32>
    %cst_25 = arith.constant 1.000000e+00 : f32
    %33 = vector.broadcast %cst_25 : f32 to vector<8x128xf32>
    %34 = arith.divf %33, %32 : vector<8x128xf32>
    %cst_26 = arith.constant 0.000000e+00 : f32
    %35 = vector.broadcast %cst_26 : f32 to vector<8x128xf32>
    %36 = arith.cmpf oge, %26, %35 : vector<8x128xf32>
    %37 = arith.mulf %30, %34 : vector<8x128xf32>
    %38 = arith.select %36, %34, %37 : vector<8x128xi1>, vector<8x128xf32>
    %c0_27 = arith.constant 0 : index
    %c0_28 = arith.constant 0 : index
    %39 = vector.load %arg10[%c0_27, %c0_28] : memref<8x128xf32, #tpu.memory_space<vmem>>, vector<8x128xf32>
    tpu.vector_store %arg10[%c0_27, %c0_28], %38 {strides = array<i32>} : memref<8x128xf32, #tpu.memory_space<vmem>>, vector<8x128xf32>,
    return
  }
  func.func @transform_0(%arg0: i32, %arg1: i32) -> (i32, i32) {
    %c0_i32 = arith.constant 0 : i32
    %c0_i32_0 = arith.constant 0 : i32
    return %arg0, %c0_i32 : i32, i32
  }
  func.func @transform_1(%arg0: i32, %arg1: i32) -> (i32, i32) {
    %c0_i32 = arith.constant 0 : i32
    %c0_i32_0 = arith.constant 0 : i32
    return %c0_i32, %arg1 : i32, i32
  }
  func.func @transform_2(%arg0: i32, %arg1: i32) -> (i32, i32) {
    %c0_i32 = arith.constant 0 : i32
    %c0_i32_0 = arith.constant 0 : i32
    return %c0_i32, %arg1 : i32, i32
  }
  func.func @transform_3(%arg0: i32, %arg1: i32) -> (i32, i32) {
    %c0_i32 = arith.constant 0 : i32
    %c0_i32_0 = arith.constant 0 : i32
    return %c0_i32, %arg1 : i32, i32
  }
  func.func @transform_4(%arg0: i32, %arg1: i32) -> (i32, i32) {
    %c0_i32 = arith.constant 0 : i32
    %c0_i32_0 = arith.constant 0 : i32
    return %c0_i32, %arg1 : i32, i32
  }
  func.func @transform_5(%arg0: i32, %arg1: i32) -> (i32, i32) {
    %c0_i32 = arith.constant 0 : i32
    return %arg0, %arg1 : i32, i32
  }
  func.func @transform_6(%arg0: i32, %arg1: i32) -> (i32, i32) {
    %c0_i32 = arith.constant 0 : i32
    return %arg0, %arg1 : i32, i32
  }
  func.func @transform_7(%arg0: i32, %arg1: i32) -> (i32, i32) {
    %c0_i32 = arith.constant 0 : i32
    return %arg0, %arg1 : i32, i32
  }
  func.func @transform_8(%arg0: i32, %arg1: i32) -> (i32, i32) {
    %c0_i32 = arith.constant 0 : i32
    return %arg0, %arg1 : i32, i32
  }
  func.func @transform_9(%arg0: i32, %arg1: i32) -> (i32, i32) {
    %c0_i32 = arith.constant 0 : i32
    return %arg0, %arg1 : i32, i32
  }
  func.func @transform_10(%arg0: i32, %arg1: i32) -> (i32, i32) {
    %c0_i32 = arith.constant 0 : i32
    return %arg0, %arg1 : i32, i32
  }
}

</mosaic_0001>

<bundles_post_ra>
// kernel: tpu_custom_call.1
= control target key start
LH: loop header
LB: loop body
LE: loop exit
PB: predicated region body
PF: predicated region fallthrough
CT: control target
= control target key end

     0   :  { %16 = vsyncpa [#allocation3], 0  ;;  %s625_s0 = inlined_call_operand.hbm [shape: f32[8,32], index: 0, kind: input, shape index: {}]   ;;  %s626_s1 = inlined_call_operand.hbm [shape: bf16[32,128], index: 1, kind: input, shape index: {}]   ;;  %s627_s2 = inlined_call_operand.hbm [shape: bf16[32,128], index: 2, kind: input, shape index: {}]   ;;  %s628_s3 = inlined_call_operand.vmem [shape: f32[1,128], index: 3, kind: input, shape index: {}]   ;;  %s629_s4 = inlined_call_operand.vmem [shape: f32[1,128], index: 4, kind: input, shape index: {}]   ;;  %s630_s5 = inlined_call_operand.vmem [shape: f32[8,128], index: 5, kind: input, shape index: {}]   ;;  %s631_s6 = inlined_call_operand.vmem [shape: f32[8,128], index: 6, kind: input, shape index: {}]   ;;  %s632_s7 = inlined_call_operand.vmem [shape: f32[8,128], index: 7, kind: input, shape index: {}]   ;;  %s633_s8 = inlined_call_operand.hbm [shape: f32[8,128], index: 8, kind: output, shape index: {0}]   ;;  %s634_s9 = inlined_call_operand.hbm [shape: f32[8,128], index: 9, kind: output, shape index: {1}]   ;;  %s635_s10 = inlined_call_operand.hbm [shape: f32[8,128], index: 10, kind: output, shape index: {2}]  }
   0x1   :  { %17 = vsyncpa [#allocation6], 0 }
   0x2   :  { %18 = vsyncpa [#allocation4], 0 }
   0x3   :  { %19 = vsyncpa [#allocation10], 0  ;;  %s460_s13 = smov [#allocation5]   ;;  %s320_s17 = scalar_lea.hbm %s626_s1, 256 }
   0x4   :  { %s35_s14 = sshll.u32 %s460_s13, 4  ;;  %p321_p0 = scmp.ne.s32.totalorder %s626_s1, %s320_s17  ;;  %s36_s14 = int_to_ptr.vmem [resolvable:$true] %s35_s14 }
   0x5   :  { %p324_p1 = scmp.lt.u32.totalorder %s320_s17, %s626_s1 }
   0x7   :  { %p326_p2 = pnand %p324_p1, %p321_p0 }
   0x9   :  { %329 = shalt.err (!%p326_p2)
}
   0xa   :  { %s330_s22 = scalar_lea.vmem %s36_s14, 256  ;;  %p335_p4 = scmp.lt.s32.totalorder %s36_s14, %s36_s14 }
   0xb   :  { %p331_p3 = scmp.ne.s32.totalorder %s36_s14, %s330_s22  ;;  %p336_p5 = scmp.lt.s32.totalorder %s330_s22, %s330_s22 }
   0xd   :  { %p337_p6 = por %p336_p5, %p335_p4 }
   0xf   :  { %p338_p7 = pnand %p337_p6, %p331_p3 }
  0x11   :  { %341 = shalt.err (!%p338_p7)
}
  0x12   :  { %s461_s23 = smov 64   ;;  %s462_s24 = smov 4  }
  0x13   :  { %41 = dma.hbm_to_vmem [thread:$0]  %s626_s1, 256, %s36_s14, [#allocation6], %s461_s23, %s461_s23, %s462_s24  }
  0x14   :  { %s463_s27 = smov [#allocation2]   ;;  %s464_s29 = smov [#allocation7]  }
  0x15   :  { %s26_s28 = sshll.u32 %s463_s27, 4  ;;  %s47_s30 = sshll.u32 %s464_s29, 4  ;;  %s27_s28 = int_to_ptr.vmem [resolvable:$true] %s26_s28  ;;  %s48_s30 = int_to_ptr.vmem [resolvable:$true] %s47_s30 }
  0x16   :  { %s342_s13 = scalar_lea.hbm %s625_s0, 128 }
  0x17   :  { %p343_p8 = scmp.ne.s32.totalorder %s625_s0, %s342_s13  ;;  %p346_p9 = scmp.lt.u32.totalorder %s342_s13, %s625_s0 }
  0x19   :  { %p348_p10 = pnand %p346_p9, %p343_p8 }
  0x1b   :  { %351 = shalt.err (!%p348_p10)
}
  0x1c   :  { %s352_s1 = scalar_lea.vmem %s27_s28, 128  ;;  %p357_p12 = scmp.lt.s32.totalorder %s27_s28, %s27_s28 }
  0x1d   :  { %p353_p11 = scmp.ne.s32.totalorder %s27_s28, %s352_s1  ;;  %p358_p13 = scmp.lt.s32.totalorder %s352_s1, %s352_s1 }
  0x1f   :  { %p359_p0 = por %p358_p13, %p357_p12 }
  0x21   :  { %p360_p1 = pnand %p359_p0, %p353_p11 }
  0x23   :  { %363 = shalt.err (!%p360_p1)
}
  0x24   :  { %29 = dma.hbm_to_vmem [thread:$0]  %s625_s0, 128, %s27_s28, [#allocation3]  }
  0x25   :  { %s364_s22 = scalar_lea.hbm %s627_s2, 256 }
  0x26   :  { %p365_p2 = scmp.ne.s32.totalorder %s627_s2, %s364_s22  ;;  %p368_p3 = scmp.lt.u32.totalorder %s364_s22, %s627_s2 }
  0x28   :  { %p370_p4 = pnand %p368_p3, %p365_p2 }
  0x2a   :  { %373 = shalt.err (!%p370_p4)
}
  0x2b   :  { %s374_s11 = scalar_lea.vmem %s48_s30, 256  ;;  %p379_p6 = scmp.lt.s32.totalorder %s48_s30, %s48_s30 }
  0x2c   :  { %p375_p5 = scmp.ne.s32.totalorder %s48_s30, %s374_s11  ;;  %p380_p7 = scmp.lt.s32.totalorder %s374_s11, %s374_s11 }
  0x2e   :  { %p381_p8 = por %p380_p7, %p379_p6 }
  0x30   :  { %p382_p9 = pnand %p381_p8, %p375_p5 }
  0x32   :  { %385 = shalt.err (!%p382_p9)
}
  0x33   :  { %53 = dma.hbm_to_vmem [thread:$0]  %s627_s2, 256, %s48_s30, [#allocation6], %s461_s23, %s461_s23, %s462_s24  }
  0x34   :  { %452 = dma.done.wait [#allocation3], 128  }
  0x35   :  { %453 = vsyncadd [#allocation3], 4294967168 }
  0x36   :  { %454 = dma.done.wait [#allocation6], 512  }
  0x37   :  { %455 = vsyncadd [#allocation6], 4294966784  ;;  %v465_v0 = vmov 0.0   ;;  %vm466_vm0 = vmmov 0   ;;  %v312_v1 = vld [vmem:[#allocation5] sm:$0xff]   ;;  %v313_v2 = vld [vmem:[#allocation7] sm:$0xff]  }
  0x38   :  { %286 = vmatprep.subr.bf16.mxu0 %v465_v0  ;;  %294 = vmatprep.subr.bf16.mxu1 %v465_v0  ;;  %v314_v3 = vld [vmem:[#allocation5 + $0x8] sm:$0xff]   ;;  %v315_v4 = vld [vmem:[#allocation7 + $0x8] sm:$0xff]   ;;  %vm99_vm1 = vcmask 261120  }
  0x39   :  { %290 = vmatprep.mubr.msk.bf16.mxu0 %vm466_vm0, %v465_v0  ;;  %298 = vmatprep.mubr.msk.bf16.mxu1 %vm466_vm0, %v465_v0  ;;  %v74_v5 = vld [vmem:[#allocation2] sm:$0xff] }
  0x3a   :  { %287 = vmatpush3.bf16.msra.mxu0 %v312_v1  ;;  %295 = vmatpush3.bf16.msra.mxu1 %v313_v2  ;;  %v75_v6 = vpack.c.bf16 %v74_v5, %v74_v5  ;;  %v272_v7 = vld [vmem:[%s628_s3] ss:$0 sm:$0xff]  ;;  %s467_s3 = smov [#allocation9]  }
  0x3b   :  { %288 = vmatprep.subr.bf16.mxu0 %v465_v0  ;;  %296 = vmatprep.subr.bf16.mxu1 %v465_v0  ;;  %v276_v8 = vld [vmem:[%s629_s4] ss:$0 sm:$0xff]  ;;  %s245_s17 = sshll.u32 %s467_s3, 4  ;;  %s468_s4 = smov [#allocation11]   ;;  %s246_s17 = int_to_ptr.vmem [resolvable:$true] %s245_s17 }
  0x3c   :  { %v206_v10 = vld [vmem:[%s630_s5] sm:$0xff]  ;;  %s255_s18 = sshll.u32 %s468_s4, 4  ;;  %s386_s1 = scalar_lea.vmem %s246_s17, 128  ;;  %s579_s18 = int_to_ptr.vmem [resolvable:$true] %s255_s18 }
  0x3d   :  { %v208_v13 = vld [vmem:[%s631_s6] sm:$0xff]  ;;  %p387_p10 = scmp.ne.s32.totalorder %s246_s17, %s386_s1  ;;  %p391_p11 = scmp.lt.s32.totalorder %s246_s17, %s246_s17 }
  0x3e   :  { %289 = vmatpush3.bf16.msra.mxu0 %v314_v3  ;;  %297 = vmatpush3.bf16.msra.mxu1 %v315_v4  ;;  %v214_v25 = vld [vmem:[%s632_s7] sm:$0xff]  ;;  %p392_p12 = scmp.lt.s32.totalorder %s386_s1, %s386_s1 }
  0x40   :  { %p393_p13 = por %p392_p12, %p391_p11 }
  0x41   :  { %291 = vmatmul.mubr.msk.bf16.vlgmr.msra.gmra.mrb[0].mxu0 %vm99_vm1, %v75_v6  ;;  %299 = vmatmul.mubr.msk.bf16.vlgmr.msra.gmra.mrb[0].mxu1 %vm99_vm1, %v75_v6 }
  0x42   :  { %p394_p0 = pnand %p393_p13, %p387_p10 }
 0x114   :  { %v137_v9 = vpop.f32.mrb[0].mxu0  ;;  %v200_v12 = vpop.f32.mrb[0].mxu1 }
 0x115   :  { %v138_v11 = vadd.f32 %v272_v7, %v137_v9  ;;  %v292_v14 = vpop.f32.mrb[1].mxu0  ;;  %v201_v15 = vadd.f32 %v276_v8, %v200_v12  ;;  %v300_v16 = vpop.f32.mrb[1].mxu1 }
 0x116   :  { %v140_v17 = vpop.f32.mrb[2].mxu0  ;;  %v203_v19 = vpop.f32.mrb[2].mxu1 }
 0x117   :  { %v207_v18 = vadd.f32 %v206_v10, %v138_v11  ;;  %v293_v20 = vpop.f32.mrb[3].mxu0  ;;  %v209_v21 = vadd.f32 %v208_v13, %v201_v15  ;;  %v301_v22 = vpop.f32.mrb[3].mxu1 }
 0x119   :  { %v210_v23 = vsub.f32 0.0, %v207_v18  ;;  %v211_v24 = vsub.f32 0.0, %v209_v21 }
 0x11b   :  { %212 = vst [vmem:[#allocation9] sm:$0xff] %v210_v23  ;;  %v215_v26 = vsub.f32 %v210_v23, %v211_v24  ;;  %213 = vst [vmem:[#allocation11] sm:$0xff] %v211_v24 }
 0x11c   :  { %397 = shalt.err (!%p394_p0)
}
 0x11d   :  { %s398_s20 = scalar_lea.hbm %s634_s9, 128 }
 0x11e   :  { %p399_p1 = scmp.ne.s32.totalorder %s634_s9, %s398_s20  ;;  %p402_p2 = scmp.lt.u32.totalorder %s398_s20, %s634_s9 }
 0x120   :  { %p404_p3 = pnand %p402_p2, %p399_p1 }
 0x122   :  { %407 = shalt.err (!%p404_p3)
}
 0x123   :  { %248 = dma.vmem_to_hbm [thread:$0]  %s246_s17, 128, %s634_s9, [#allocation10]  }
 0x124   :  { %s408_s29 = scalar_lea.vmem %s579_s18, 128  ;;  %p413_p5 = scmp.lt.s32.totalorder %s579_s18, %s579_s18 }
 0x125   :  { %p409_p4 = scmp.ne.s32.totalorder %s579_s18, %s408_s29  ;;  %p414_p6 = scmp.lt.s32.totalorder %s408_s29, %s408_s29 }
 0x127   :  { %p415_p7 = por %p414_p6, %p413_p5 }
 0x129   :  { %p416_p8 = pnand %p415_p7, %p409_p4 }
 0x12b   :  { %419 = shalt.err (!%p416_p8)
}
 0x12c   :  { %s420_s28 = scalar_lea.hbm %s635_s10, 128 }
 0x12d   :  { %p421_p9 = scmp.ne.s32.totalorder %s635_s10, %s420_s28  ;;  %p424_p10 = scmp.lt.u32.totalorder %s420_s28, %s635_s10 }
 0x12f   :  { %p426_p11 = pnand %p424_p10, %p421_p9 }
 0x131   :  { %429 = shalt.err (!%p426_p11)
}
 0x132   :  { %258 = dma.vmem_to_hbm [thread:$0]  %s579_s18, 128, %s635_s10, [#allocation10]   ;;  %v216_v27 = vadd.f32 %v215_v26, %v214_v25 }
 0x133   :  { %s469_s13 = smov [#allocation8]  }
 0x134   :  { %v217_v28 = vmul.f32 10.0, %v216_v27  ;;  %s235_s15 = sshll.u32 %s469_s13, 4  ;;  %s236_s15 = int_to_ptr.vmem [resolvable:$true] %s235_s15 }
 0x135   :  { %s430_s16 = scalar_lea.vmem %s236_s15, 128  ;;  %p435_p13 = scmp.lt.s32.totalorder %s236_s15, %s236_s15 }
 0x136   :  { %v218_v29 = vand.u32 2147483647, %v217_v28  ;;  %vm225_vm2 = vcmp.ge.f32.partialorder %v217_v28, 0.0  ;;  %p431_p12 = scmp.ne.s32.totalorder %s236_s15, %s430_s16  ;;  %p436_p0 = scmp.lt.s32.totalorder %s430_s16, %s430_s16 }
 0x138   :  { %v219_v30 = vsub.f32 0.0, %v218_v29  ;;  %p437_p1 = por %p436_p0, %p435_p13 }
 0x13a   :  { %v220_v31 = vmul.f32 1.442695, %v219_v30  ;;  %p438_p2 = pnand %p437_p1, %p431_p12 }
 0x13c   :  { %316 = vpow2.f32 %v220_v31 }
 0x146   :  { %v317_v32 = vpop.eup %316 }
 0x147   :  { %v222_v33 = vadd.f32 1.0, %v317_v32 }
 0x149   :  { %318 = vrcp.f32 %v222_v33 }
 0x153   :  { %v319_v34 = vpop.eup %318 }
 0x154   :  { %v226_v35 = vmul.f32 %v319_v34, %v317_v32 }
 0x156   :  { %v227_v36 = vsel %vm225_vm2, %v319_v34, %v226_v35 }
 0x157   :  { %228 = vst [vmem:[#allocation8] sm:$0xff] %v227_v36 }
 0x158   :  { %441 = shalt.err (!%p438_p2)
}
 0x159   :  { %s442_s17 = scalar_lea.hbm %s633_s8, 128 }
 0x15a   :  { %p443_p3 = scmp.ne.s32.totalorder %s633_s8, %s442_s17  ;;  %p446_p4 = scmp.lt.u32.totalorder %s442_s17, %s633_s8 }
 0x15c   :  { %p448_p5 = pnand %p446_p4, %p443_p3 }
 0x15e   :  { %451 = shalt.err (!%p448_p5)
}
 0x15f   :  { %238 = dma.vmem_to_hbm [thread:$0]  %s236_s15, 128, %s633_s8, [#allocation4]  }
 0x160   :  { %456 = dma.done.wait [#allocation4], 128  }
 0x161   :  { %457 = vsyncadd [#allocation4], 4294967168 }
 0x162   :  { %458 = dma.done.wait [#allocation10], 256  }
 0x163   :  { %459 = vsyncadd [#allocation10], 4294967040 }
 0x164   :  { %268 = vsyncpa [#allocation3], 1 }
 0x165   :  { %269 = vsyncpa [#allocation6], 1 }
 0x166   :  { %270 = vsyncpa [#allocation4], 1 }
 0x167   :  { %271 = vsyncpa [#allocation10], 1 }

</bundles_post_ra>
